<compile_context>
chip_gen: v7x
topology: tpu7x:2x2x1
jax: 0.10.0
libtpu: 0.0.40
codegen_flags: <defaults>
</compile_context>

<pallas_src>
import jax
import jax.numpy as jnp
from jax.experimental import pallas as pl
from jax.experimental.pallas import tpu as pltpu


def final_layer_kernel(shift_ref, scale1_ref, x_ref, w_lin_ref, b_lin_ref, out_ref):
    """One (TM, H) tile of one batch element.

    shift_ref, scale1_ref : (1, H)  f32   -- adaLN shift and (1 + scale)
    x_ref                 : (TM, H)       -- native dtype
    w_lin_ref             : (H, O_pad)
    b_lin_ref             : (1, O_pad)
    out_ref               : (TM, O_pad)
    """
    xf = x_ref[...].astype(jnp.float32)

    # --- one-pass LayerNorm statistics (biased variance, matches torch LN) ---
    mean = jnp.mean(xf, axis=-1, keepdims=True)                      # (TM, 1)
    mean_sq = jnp.mean(xf * xf, axis=-1, keepdims=True)              # (TM, 1)
    var = mean_sq - mean * mean
    inv = jax.lax.rsqrt(var + 1e-6)                                  # (TM, 1)

    # --- fused normalize + modulate: (x - mean) * (inv * (1+scale)) + shift ---
    y = (xf - mean) * (inv * scale1_ref[...]) + shift_ref[...]       # (TM, H) f32

    # --- final projection on the MXU; operands in weight dtype, f32 accumulate ---
    y = y.astype(w_lin_ref.dtype)
    out = jnp.dot(y, w_lin_ref[...], preferred_element_type=jnp.float32)
    out = out + b_lin_ref[...].astype(jnp.float32)
    out_ref[...] = out.astype(out_ref.dtype)


def _round_up(x, m):
    return ((x + m - 1) // m) * m


def _vmem_budget(tm, H, O_pad, x_bytes, w_bytes, out_bytes):
    """Conservative per-kernel VMEM estimate (double buffers + f32 temporaries)."""
    return (2 * tm * H * x_bytes            # x double-buffer
            + 2 * tm * O_pad * out_bytes    # out double-buffer
            + 2 * H * O_pad * w_bytes       # w_lin (worst case: double-buffered)
            + 2 * 8 * O_pad * w_bytes       # bias tile (sublane-padded)
            + 4 * 8 * H * 4                 # shift / (1 + scale) tiles
            + 4 * tm * H * 4                # live f32 LN/modulate temporaries
            + tm * O_pad * 4                # f32 matmul accumulator
            + (2 << 20))                    # slack for compiler scratch


def _choose_seq_tile(B, T, H, O_pad, x_bytes, w_bytes, out_bytes,
                     max_seq_tile, vmem_target_bytes):
    tm = max(8, min(_round_up(max_seq_tile, 8), _round_up(T, 8)))
    # Keep >= 2 grid steps so both v7x TensorCores get work when B == 1.
    if B == 1 and T > 8:
        tm = min(tm, max(8, _round_up(pl.cdiv(T, 2), 8)))
    # Shrink until the VMEM budget fits the target (44 MiB default keeps us
    # safely under v7x's 64 MiB physical VMEM; v5e/v6e have more headroom).
    while tm > 8 and _vmem_budget(tm, H, O_pad, x_bytes, w_bytes, out_bytes) > vmem_target_bytes:
        tm = max(8, _round_up(tm // 2, 8))
    return tm


def final_layer(x, c, w_mod, b_mod, w_lin, b_lin, *,
                max_seq_tile=1024,
                vmem_target_bytes=44 * 1024 * 1024,
                matmul_dtype=None,
                cast_x_to_bf16=False,
                trim_output=True):
    """x: (B, T, H), c: (B, H), w_mod: (H, 2H), b_mod: (2H,),
       w_lin: (H, O), b_lin: (O,)  ->  (B, T, O)  (or (B, T, O_pad) if
       trim_output=False, letting the downstream unpatchify drop the pad)."""
    B, T, H = x.shape
    O = w_lin.shape[1]

    # --- adaLN modulation hoisted out of the kernel (tiny M=1 matmul) ---
    cf = c.astype(jnp.float32)
    silu = cf * jax.nn.sigmoid(cf)
    mod = silu @ w_mod.astype(jnp.float32) + b_mod.astype(jnp.float32)
    shift = mod[:, :H].reshape(B, 1, H)                      # (B, 1, H) f32
    scale1 = (1.0 + mod[:, H:2 * H]).reshape(B, 1, H)        # (B, 1, H) f32

    # --- optional fast paths (inference): halve the HBM-bound x read and/or
    #     the MXU operand width (mainly useful on v5e) ---
    if cast_x_to_bf16 and x.dtype == jnp.float32:
        x = x.astype(jnp.bfloat16)
    if matmul_dtype is not None:
        w_lin = w_lin.astype(matmul_dtype)
        b_lin = b_lin.astype(jnp.float32)

    # --- pad output features to a lane-dense multiple of 128 (unmasked vst) ---
    O_pad = _round_up(O, 128)
    if O_pad != O:
        w_lin_p = jnp.pad(w_lin, ((0, 0), (0, O_pad - O)))
        b_lin_p = jnp.pad(b_lin, ((0, O_pad - O),))
    else:
        w_lin_p, b_lin_p = w_lin, b_lin
    b_lin2 = b_lin_p.reshape(1, O_pad)

    x_bytes = jnp.dtype(x.dtype).itemsize
    w_bytes = jnp.dtype(w_lin_p.dtype).itemsize
    out_bytes = x_bytes

    # --- sequence tiling: big tiles, padded T, explicit VMEM limit ---
    TM = _choose_seq_tile(B, T, H, O_pad, x_bytes, w_bytes, out_bytes,
                          max_seq_tile, vmem_target_bytes)
    T_pad = _round_up(T, TM)
    if T_pad != T:
        x = jnp.pad(x, ((0, 0), (0, T_pad - T), (0, 0)))
    grid = (B, T_pad // TM)

    vmem_limit = int(min(max(_vmem_budget(TM, H, O_pad, x_bytes, w_bytes, out_bytes),
                             16 << 20), 64 << 20))

    def build(single_buffer_weights):
        wkw = dict(pipeline_mode=pl.Buffered(1)) if single_buffer_weights else {}
        return pl.pallas_call(
            final_layer_kernel,
            out_shape=jax.ShapeDtypeStruct((B, T_pad, O_pad), x.dtype),
            grid_spec=pltpu.PrefetchScalarGridSpec(
                num_scalar_prefetch=0,
                grid=grid,
                in_specs=[
                    pl.BlockSpec((None, 1, H), lambda b, t: (b, 0, 0)),   # shift
                    pl.BlockSpec((None, 1, H), lambda b, t: (b, 0, 0)),   # 1+scale
                    pl.BlockSpec((None, TM, H), lambda b, t: (b, t, 0)),  # x tile
                    pl.BlockSpec((H, O_pad), lambda b, t: (0, 0), **wkw),  # w_lin
                    pl.BlockSpec((1, O_pad), lambda b, t: (0, 0), **wkw),  # b_lin
                ],
                out_specs=pl.BlockSpec((None, TM, O_pad), lambda b, t: (b, t, 0)),
            ),
            compiler_params=pltpu.CompilerParams(
                dimension_semantics=("parallel", "parallel"),
                vmem_limit_bytes=vmem_limit),
        )

    args = (shift, scale1, x, w_lin_p, b_lin2)
    try:
        # Grid-invariant weights: single-buffered (saves VMEM for bigger TM).
        out_p = build(True)(*args)
    except Exception:
        # Older JAX without BlockSpec(pipeline_mode=...): plain double-buffering.
        out_p = build(False)(*args)

    if T_pad != T:
        out_p = out_p[:, :T, :]
    if trim_output and O_pad != O:
        # NOTE: skipping this (trim_output=False) avoids a full extra HBM pass
        # if the downstream unpatchify can consume the lane-padded layout.
        out_p = out_p[:, :, :O]
    return out_p


def final_layer_ref(x, c, w_mod, b_mod, w_lin, b_lin):
    """Pure-JAX reference mirroring the PyTorch forward."""
    H = x.shape[-1]
    silu = c * jax.nn.sigmoid(c)
    mod = silu @ w_mod + b_mod
    shift, scale = mod[:, :H], mod[:, H:]
    mean = jnp.mean(x, axis=-1, keepdims=True)
    var = jnp.mean((x - mean) ** 2, axis=-1, keepdims=True)
    xn = (x - mean) * jax.lax.rsqrt(var + 1e-6)
    y = xn * (1 + scale[:, None, :]) + shift[:, None, :]
    return y @ w_lin + b_lin


if __name__ == "__main__":
    # Small shapes consistent with the module:
    B, T, H = 2, 8, 32
    patch_size, out_channels = 2, 4
    O = patch_size * patch_size * out_channels  # 16

    key = jax.random.PRNGKey(0)
    kx, kc, k1, k2, k3, k4 = jax.random.split(key, 6)

    x = jax.random.normal(kx, (B, T, H), dtype=jnp.float32)
    c = jax.random.normal(kc, (B, H), dtype=jnp.float32)

    # Deterministic synthetic params; Linear weights stored as (in, out).
    w_mod = jax.random.normal(k1, (H, 2 * H), dtype=jnp.float32) * 0.02
    b_mod = jax.random.normal(k2, (2 * H,), dtype=jnp.float32) * 0.02
    w_lin = jax.random.normal(k3, (H, O), dtype=jnp.float32) * 0.02
    b_lin = jax.random.normal(k4, (O,), dtype=jnp.float32) * 0.02

    out = final_layer(x, c, w_mod, b_mod, w_lin, b_lin)
    out = jax.block_until_ready(out)

    ref = final_layer_ref(x, c, w_mod, b_mod, w_lin, b_lin)
    assert out.shape == (B, T, O)
    # Tolerance accounts for TPU matmul / one-pass-variance rounding differences.
    assert jnp.allclose(out, ref, atol=5e-3, rtol=5e-3), "mismatch vs reference"

    print("KERNEL_OK")
</pallas_src>

<mosaic_0001>
module attributes {stable_mosaic.version = 11 : i64} {
  func.func @final_layer_kernel(%arg0: i32, %arg1: i32, %arg2: memref<1x1x32xf32, #tpu.memory_space<vmem>>, %arg3: memref<1x1x32xf32, #tpu.memory_space<vmem>>, %arg4: memref<1x8x32xf32, #tpu.memory_space<vmem>>, %arg5: memref<32x128xf32, #tpu.memory_space<vmem>>, %arg6: memref<1x128xf32, #tpu.memory_space<vmem>>, %arg7: memref<1x8x128xf32, #tpu.memory_space<vmem>>) attributes {dimension_semantics = [#tpu.dimension_semantics<parallel>, #tpu.dimension_semantics<parallel>], iteration_bounds = array<i64: 2, 1>, scalar_prefetch = 0 : i64, scratch_operands = 0 : i64, tpu.core_type = #tpu.core_type<tc>, window_params = [{transform_indices = @transform_0, window_bounds = array<i64: 1, 1, 32>}, {transform_indices = @transform_1, window_bounds = array<i64: 1, 1, 32>}, {transform_indices = @transform_2, window_bounds = array<i64: 1, 8, 32>}, {pipeline_mode = #tpu.pipeline_mode<synchronous>, transform_indices = @transform_3, window_bounds = array<i64: 32, 128>}, {pipeline_mode = #tpu.pipeline_mode<synchronous>, transform_indices = @transform_4, window_bounds = array<i64: 1, 128>}, {transform_indices = @transform_5, window_bounds = array<i64: 1, 8, 128>}]} {
    %c0 = arith.constant 0 : index
    %c0_0 = arith.constant 0 : index
    %c0_1 = arith.constant 0 : index
    %0 = vector.load %arg4[%c0, %c0_0, %c0_1] : memref<1x8x32xf32, #tpu.memory_space<vmem>>, vector<1x8x32xf32>
    %1 = vector.shape_cast %0 : vector<1x8x32xf32> to vector<8x32xf32>
    %cst = arith.constant dense<0.000000e+00> : vector<8xf32>
    %2 = vector.multi_reduction <add>, %1, %cst [1] : vector<8x32xf32> to vector<8xf32>
    %3 = vector.shape_cast %2 : vector<8xf32> to vector<8x1xf32>
    %cst_2 = arith.constant 3.200000e+01 : f32
    %4 = vector.broadcast %cst_2 : f32 to vector<8x1xf32>
    %5 = arith.divf %3, %4 : vector<8x1xf32>
    %6 = arith.mulf %1, %1 : vector<8x32xf32>
    %cst_3 = arith.constant dense<0.000000e+00> : vector<8xf32>
    %7 = vector.multi_reduction <add>, %6, %cst_3 [1] : vector<8x32xf32> to vector<8xf32>
    %8 = vector.shape_cast %7 : vector<8xf32> to vector<8x1xf32>
    %cst_4 = arith.constant 3.200000e+01 : f32
    %9 = vector.broadcast %cst_4 : f32 to vector<8x1xf32>
    %10 = arith.divf %8, %9 : vector<8x1xf32>
    %11 = arith.mulf %5, %5 : vector<8x1xf32>
    %12 = arith.subf %10, %11 : vector<8x1xf32>
    %cst_5 = arith.constant 9.99999997E-7 : f32
    %13 = vector.broadcast %cst_5 : f32 to vector<8x1xf32>
    %14 = arith.addf %12, %13 : vector<8x1xf32>
    %15 = math.rsqrt %14 : vector<8x1xf32>
    %16 = vector.broadcast %5 : vector<8x1xf32> to vector<8x32xf32>
    %17 = arith.subf %1, %16 : vector<8x32xf32>
    %c0_6 = arith.constant 0 : index
    %c0_7 = arith.constant 0 : index
    %c0_8 = arith.constant 0 : index
    %18 = vector.load %arg3[%c0_6, %c0_7, %c0_8] : memref<1x1x32xf32, #tpu.memory_space<vmem>>, vector<1x1x32xf32>
    %19 = vector.shape_cast %18 : vector<1x1x32xf32> to vector<1x32xf32>
    %20 = vector.broadcast %15 : vector<8x1xf32> to vector<8x32xf32>
    %21 = vector.broadcast %19 : vector<1x32xf32> to vector<8x32xf32>
    %22 = arith.mulf %20, %21 : vector<8x32xf32>
    %23 = arith.mulf %17, %22 : vector<8x32xf32>
    %c0_9 = arith.constant 0 : index
    %c0_10 = arith.constant 0 : index
    %c0_11 = arith.constant 0 : index
    %24 = vector.load %arg2[%c0_9, %c0_10, %c0_11] : memref<1x1x32xf32, #tpu.memory_space<vmem>>, vector<1x1x32xf32>
    %25 = vector.shape_cast %24 : vector<1x1x32xf32> to vector<1x32xf32>
    %26 = vector.broadcast %25 : vector<1x32xf32> to vector<8x32xf32>
    %27 = arith.addf %23, %26 : vector<8x32xf32>
    %c0_12 = arith.constant 0 : index
    %c0_13 = arith.constant 0 : index
    %28 = vector.load %arg5[%c0_12, %c0_13] : memref<32x128xf32, #tpu.memory_space<vmem>>, vector<32x128xf32>
    %cst_14 = arith.constant dense<0.000000e+00> : vector<8x128xf32>
    %29 = tpu.matmul %27, %28, %cst_14 {dimension_numbers = #tpu.dot_dimension_numbers<[1], [0], [0], [1], [0, 0, 1, 1], [], []>} : vector<8x32xf32>, vector<32x128xf32>, vector<8x128xf32> -> vector<8x128xf32>
    %c0_15 = arith.constant 0 : index
    %c0_16 = arith.constant 0 : index
    %30 = vector.load %arg6[%c0_15, %c0_16] : memref<1x128xf32, #tpu.memory_space<vmem>>, vector<1x128xf32>
    %31 = vector.broadcast %30 : vector<1x128xf32> to vector<8x128xf32>
    %32 = arith.addf %29, %31 : vector<8x128xf32>
    %c0_17 = arith.constant 0 : index
    %c0_18 = arith.constant 0 : index
    %c0_19 = arith.constant 0 : index
    %33 = vector.load %arg7[%c0_17, %c0_18, %c0_19] : memref<1x8x128xf32, #tpu.memory_space<vmem>>, vector<1x8x128xf32>
    %34 = vector.shape_cast %33 : vector<1x8x128xf32> to vector<8x128xf32>
    %35 = vector.shape_cast %32 : vector<8x128xf32> to vector<1x8x128xf32>
    tpu.vector_store %arg7[%c0_17, %c0_18, %c0_19], %35 {strides = array<i32>} : memref<1x8x128xf32, #tpu.memory_space<vmem>>, vector<1x8x128xf32>,
    return
  }
  func.func @transform_0(%arg0: i32, %arg1: i32) -> (i32, i32, i32) {
    %c0_i32 = arith.constant 0 : i32
    %c0_i32_0 = arith.constant 0 : i32
    %c0_i32_1 = arith.constant 0 : i32
    return %arg0, %c0_i32, %c0_i32_0 : i32, i32, i32
  }
  func.func @transform_1(%arg0: i32, %arg1: i32) -> (i32, i32, i32) {
    %c0_i32 = arith.constant 0 : i32
    %c0_i32_0 = arith.constant 0 : i32
    %c0_i32_1 = arith.constant 0 : i32
    return %arg0, %c0_i32, %c0_i32_0 : i32, i32, i32
  }
  func.func @transform_2(%arg0: i32, %arg1: i32) -> (i32, i32, i32) {
    %c0_i32 = arith.constant 0 : i32
    %c0_i32_0 = arith.constant 0 : i32
    return %arg0, %arg1, %c0_i32 : i32, i32, i32
  }
  func.func @transform_3(%arg0: i32, %arg1: i32) -> (i32, i32) {
    %c0_i32 = arith.constant 0 : i32
    %c0_i32_0 = arith.constant 0 : i32
    %c0_i32_1 = arith.constant 0 : i32
    return %c0_i32, %c0_i32_0 : i32, i32
  }
  func.func @transform_4(%arg0: i32, %arg1: i32) -> (i32, i32) {
    %c0_i32 = arith.constant 0 : i32
    %c0_i32_0 = arith.constant 0 : i32
    %c0_i32_1 = arith.constant 0 : i32
    return %c0_i32, %c0_i32_0 : i32, i32
  }
  func.func @transform_5(%arg0: i32, %arg1: i32) -> (i32, i32, i32) {
    %c0_i32 = arith.constant 0 : i32
    %c0_i32_0 = arith.constant 0 : i32
    return %arg0, %arg1, %c0_i32 : i32, i32, i32
  }
}

module attributes {stable_mosaic.version = 11 : i64} {
  func.func @final_layer_kernel(%arg0: i32, %arg1: i32, %arg2: memref<1x1x32xf32, #tpu.memory_space<vmem>>, %arg3: memref<1x1x32xf32, #tpu.memory_space<vmem>>, %arg4: memref<1x8x32xf32, #tpu.memory_space<vmem>>, %arg5: memref<32x128xf32, #tpu.memory_space<vmem>>, %arg6: memref<1x128xf32, #tpu.memory_space<vmem>>, %arg7: memref<1x8x128xf32, #tpu.memory_space<vmem>>) attributes {dimension_semantics = [#tpu.dimension_semantics<parallel>, #tpu.dimension_semantics<parallel>], iteration_bounds = array<i64: 2, 1>, scalar_prefetch = 0 : i64, scratch_operands = 0 : i64, tpu.core_type = #tpu.core_type<tc>, window_params = [{transform_indices = @transform_0, window_bounds = array<i64: 1, 1, 32>}, {transform_indices = @transform_1, window_bounds = array<i64: 1, 1, 32>}, {transform_indices = @transform_2, window_bounds = array<i64: 1, 8, 32>}, {pipeline_mode = #tpu.pipeline_mode<synchronous>, transform_indices = @transform_3, window_bounds = array<i64: 32, 128>}, {pipeline_mode = #tpu.pipeline_mode<synchronous>, transform_indices = @transform_4, window_bounds = array<i64: 1, 128>}, {transform_indices = @transform_5, window_bounds = array<i64: 1, 8, 128>}]} {
    %c0 = arith.constant 0 : index
    %c0_0 = arith.constant 0 : index
    %c0_1 = arith.constant 0 : index
    %0 = vector.load %arg4[%c0, %c0_0, %c0_1] : memref<1x8x32xf32, #tpu.memory_space<vmem>>, vector<1x8x32xf32>
    %1 = vector.shape_cast %0 : vector<1x8x32xf32> to vector<8x32xf32>
    %cst = arith.constant dense<0.000000e+00> : vector<8xf32>
    %2 = vector.multi_reduction <add>, %1, %cst [1] : vector<8x32xf32> to vector<8xf32>
    %3 = vector.shape_cast %2 : vector<8xf32> to vector<8x1xf32>
    %cst_2 = arith.constant 3.200000e+01 : f32
    %4 = vector.broadcast %cst_2 : f32 to vector<8x1xf32>
    %5 = arith.divf %3, %4 : vector<8x1xf32>
    %6 = arith.mulf %1, %1 : vector<8x32xf32>
    %cst_3 = arith.constant dense<0.000000e+00> : vector<8xf32>
    %7 = vector.multi_reduction <add>, %6, %cst_3 [1] : vector<8x32xf32> to vector<8xf32>
    %8 = vector.shape_cast %7 : vector<8xf32> to vector<8x1xf32>
    %cst_4 = arith.constant 3.200000e+01 : f32
    %9 = vector.broadcast %cst_4 : f32 to vector<8x1xf32>
    %10 = arith.divf %8, %9 : vector<8x1xf32>
    %11 = arith.mulf %5, %5 : vector<8x1xf32>
    %12 = arith.subf %10, %11 : vector<8x1xf32>
    %cst_5 = arith.constant 9.99999997E-7 : f32
    %13 = vector.broadcast %cst_5 : f32 to vector<8x1xf32>
    %14 = arith.addf %12, %13 : vector<8x1xf32>
    %15 = math.rsqrt %14 : vector<8x1xf32>
    %16 = vector.broadcast %5 : vector<8x1xf32> to vector<8x32xf32>
    %17 = arith.subf %1, %16 : vector<8x32xf32>
    %c0_6 = arith.constant 0 : index
    %c0_7 = arith.constant 0 : index
    %c0_8 = arith.constant 0 : index
    %18 = vector.load %arg3[%c0_6, %c0_7, %c0_8] : memref<1x1x32xf32, #tpu.memory_space<vmem>>, vector<1x1x32xf32>
    %19 = vector.shape_cast %18 : vector<1x1x32xf32> to vector<1x32xf32>
    %20 = vector.broadcast %15 : vector<8x1xf32> to vector<8x32xf32>
    %21 = vector.broadcast %19 : vector<1x32xf32> to vector<8x32xf32>
    %22 = arith.mulf %20, %21 : vector<8x32xf32>
    %23 = arith.mulf %17, %22 : vector<8x32xf32>
    %c0_9 = arith.constant 0 : index
    %c0_10 = arith.constant 0 : index
    %c0_11 = arith.constant 0 : index
    %24 = vector.load %arg2[%c0_9, %c0_10, %c0_11] : memref<1x1x32xf32, #tpu.memory_space<vmem>>, vector<1x1x32xf32>
    %25 = vector.shape_cast %24 : vector<1x1x32xf32> to vector<1x32xf32>
    %26 = vector.broadcast %25 : vector<1x32xf32> to vector<8x32xf32>
    %27 = arith.addf %23, %26 : vector<8x32xf32>
    %c0_12 = arith.constant 0 : index
    %c0_13 = arith.constant 0 : index
    %28 = vector.load %arg5[%c0_12, %c0_13] : memref<32x128xf32, #tpu.memory_space<vmem>>, vector<32x128xf32>
    %cst_14 = arith.constant dense<0.000000e+00> : vector<8x128xf32>
    %29 = tpu.matmul %27, %28, %cst_14 {dimension_numbers = #tpu.dot_dimension_numbers<[1], [0], [0], [1], [0, 0, 1, 1], [], []>} : vector<8x32xf32>, vector<32x128xf32>, vector<8x128xf32> -> vector<8x128xf32>
    %c0_15 = arith.constant 0 : index
    %c0_16 = arith.constant 0 : index
    %30 = vector.load %arg6[%c0_15, %c0_16] : memref<1x128xf32, #tpu.memory_space<vmem>>, vector<1x128xf32>
    %31 = vector.broadcast %30 : vector<1x128xf32> to vector<8x128xf32>
    %32 = arith.addf %29, %31 : vector<8x128xf32>
    %c0_17 = arith.constant 0 : index
    %c0_18 = arith.constant 0 : index
    %c0_19 = arith.constant 0 : index
    %33 = vector.load %arg7[%c0_17, %c0_18, %c0_19] : memref<1x8x128xf32, #tpu.memory_space<vmem>>, vector<1x8x128xf32>
    %34 = vector.shape_cast %33 : vector<1x8x128xf32> to vector<8x128xf32>
    %35 = vector.shape_cast %32 : vector<8x128xf32> to vector<1x8x128xf32>
    tpu.vector_store %arg7[%c0_17, %c0_18, %c0_19], %35 {strides = array<i32>} : memref<1x8x128xf32, #tpu.memory_space<vmem>>, vector<1x8x128xf32>,
    return
  }
  func.func @transform_0(%arg0: i32, %arg1: i32) -> (i32, i32, i32) {
    %c0_i32 = arith.constant 0 : i32
    %c0_i32_0 = arith.constant 0 : i32
    %c0_i32_1 = arith.constant 0 : i32
    return %arg0, %c0_i32, %c0_i32_0 : i32, i32, i32
  }
  func.func @transform_1(%arg0: i32, %arg1: i32) -> (i32, i32, i32) {
    %c0_i32 = arith.constant 0 : i32
    %c0_i32_0 = arith.constant 0 : i32
    %c0_i32_1 = arith.constant 0 : i32
    return %arg0, %c0_i32, %c0_i32_0 : i32, i32, i32
  }
  func.func @transform_2(%arg0: i32, %arg1: i32) -> (i32, i32, i32) {
    %c0_i32 = arith.constant 0 : i32
    %c0_i32_0 = arith.constant 0 : i32
    return %arg0, %arg1, %c0_i32 : i32, i32, i32
  }
  func.func @transform_3(%arg0: i32, %arg1: i32) -> (i32, i32) {
    %c0_i32 = arith.constant 0 : i32
    %c0_i32_0 = arith.constant 0 : i32
    %c0_i32_1 = arith.constant 0 : i32
    return %c0_i32, %c0_i32_0 : i32, i32
  }
  func.func @transform_4(%arg0: i32, %arg1: i32) -> (i32, i32) {
    %c0_i32 = arith.constant 0 : i32
    %c0_i32_0 = arith.constant 0 : i32
    %c0_i32_1 = arith.constant 0 : i32
    return %c0_i32, %c0_i32_0 : i32, i32
  }
  func.func @transform_5(%arg0: i32, %arg1: i32) -> (i32, i32, i32) {
    %c0_i32 = arith.constant 0 : i32
    %c0_i32_0 = arith.constant 0 : i32
    return %arg0, %arg1, %c0_i32 : i32, i32, i32
  }
}

</mosaic_0001>

<bundles_post_ra>
// kernel: tpu_custom_call.1
= control target key start
LH: loop header
LB: loop body
LE: loop exit
PB: predicated region body
PF: predicated region fallthrough
CT: control target
= control target key end

     0   :  { %s1179_s0 = inlined_call_operand.hbm [shape: f32[2,1,32], index: 0, kind: input, shape index: {}]   ;;  %s1180_s1 = inlined_call_operand.vmem [shape: f32[2,1,32], index: 1, kind: input, shape index: {}]   ;;  %s1181_s2 = inlined_call_operand.hbm [shape: f32[2,8,32], index: 2, kind: input, shape index: {}]   ;;  %s1182_s3 = inlined_call_operand.hbm [shape: f32[32,128], index: 3, kind: input, shape index: {}]   ;;  %s1183_s4 = inlined_call_operand.vmem [shape: f32[1,128], index: 4, kind: input, shape index: {}]   ;;  %s1184_s5 = inlined_call_operand.hbm [shape: f32[2,8,128], index: 5, kind: output, shape index: {}]  }
   0x1   :  { %1190 = sst [smem:[#allocation14_spill]] %s1179_s0 }
   0x2   :  { %1191 = sst [smem:[#allocation15_spill]] %s1182_s3 }
   0x3   :  { %10 = vsyncpa [#allocation3], 0 }
   0x4   :  { %12 = vsyncpa [#allocation3 + $0x1], 0 }
   0x5   :  { %13 = vsyncpa [#allocation6], 0 }
   0x6   :  { %15 = vsyncpa [#allocation6 + $0x1], 0 }
   0x7   :  { %16 = vsyncpa [#allocation4], 0 }
   0x8   :  { %18 = vsyncpa [#allocation4 + $0x1], 0  ;;  %s917_s18 = smov 0   ;;  %s919_s19 = smov 0  }
   0x9   :  { %s921_s20 = smov 0   ;;  %s923_s21 = smov 0  }
   0xa   :  { %s925_s22 = smov 0   ;;  %s927_s23 = smov 0  }
   0xb LB: > { %s948_s24 = sadd.s32 4294967295, %s876_s23   ;;  %s572_s25 = sadd.s32 4294967294, %s876_s23   ;;  %s876_s23 = sphi %s927_s23, %s24_s23   ;;  %s872_s22 = sphi %s925_s22, %s1215_s22   ;;  %s868_s21 = sphi %s923_s21, %s1214_s21   ;;  %s864_s20 = sphi %s921_s20, %s1213_s20   ;;  %s860_s19 = sphi %s919_s19, %s1212_s19   ;;  %s856_s18 = sphi %s917_s18, %s1211_s18  }
   0xc   : > { %p56_p0 = scmp.ne.s32.totalorder %s860_s19, %s856_s18  ;;  %p1185_p1 = scmp.eq.s32.totalorder %s948_s24, 0 }
   0xd   : > { %p184_p3 = scmp.eq.s32.totalorder %s572_s25, 1  ;;  %p573_p5 = scmp.ge.s32.totalorder %s876_s23, 1 }
   0xe   : > { %p957_p4 = por %p1185_p1, %p56_p0  ;;  %p191_p7 = scmp.lt.s32.totalorder %s876_s23, 3 }
   0xf   : > { %p962_p6 = por %p184_p3, %p56_p0  ;;  %s878_s29 = smov [#allocation7]  }
  0x10   : > { %s1192_s26 = scalar_select %p957_p4, 1, 0 }
  0x11   : > { %s1193_s27 = scalar_select %p962_p6, 1, 0 }
  0x12   : > { %p967_p8 = pnand %p573_p5, %p191_p7  ;;  %s203_s30 = sshll.u32 %s878_s29, 4  ;;  %s204_s30 = int_to_ptr.vmem [resolvable:$true] %s203_s30 }
  0x13   : > { %s36_s7 = sadd.s32 1, %s872_s22  ;;  %s1196_s3 = sld [smem:[#allocation15_spill]] }
  0x14   : > { %s1194_s28 = scalar_select %p967_p8, 1, 0 }
  0x15   : > { %p623_p9 = pneg %p967_p8 }
  0x17   : > { %p976_p11 = pnand %p623_p9, %p1185_p1 }
  0x19   : > { %s698_s10 = scalar_lea.hbm %s1196_s3, 512  ;;  %p700_p13 = pneg %p976_p11 }
  0x1a   : > { %p699_p12 = scmp.ne.s32.totalorder %s1196_s3, %s698_s10  ;;  %p705_p5 = scmp.lt.u32.totalorder %s698_s10, %s1196_s3 }
  0x1c   : > { %p701_p0 = pnand %p700_p13, %p699_p12 }
  0x1e   : > { %p702_p3 = pneg %p701_p0 }
  0x20   : > { %p707_p7 = pnand %p705_p5, %p702_p3 }
  0x22   : > { %710 = shalt.err (!%p707_p7)
}
  0x23   : > { %s711_s15 = scalar_lea.vmem %s204_s30, 512  ;;  %p719_p2 = scmp.lt.s32.totalorder %s204_s30, %s204_s30 }
  0x24   : > { %p712_p9 = scmp.ne.s32.totalorder %s204_s30, %s711_s15  ;;  %p720_p6 = scmp.lt.s32.totalorder %s711_s15, %s711_s15 }
  0x26   : > { %p714_p10 = pnand %p712_p9, %p700_p13  ;;  %p721_p4 = por %p720_p6, %p719_p2 }
  0x28   : > { %p715_p1 = pneg %p714_p10 }
  0x2a   : > { %p722_p8 = pnand %p721_p4, %p715_p1 }
  0x2c   : > { %725 = shalt.err (!%p722_p8)
}
  0x2d   : > { %s879_s16 = smov 128   ;;  %s880_s17 = smov 8  }
  0x2e   : > { %626 = dma.hbm_to_vmem [thread:$0]  (!%p976_p11), %s1196_s3, 512, %s204_s30, [#allocation6], %s879_s16, %s879_s16, %s880_s17  }
  0x2f   : > { %p38_p1 = scmp.ge.s32.totalorder %s36_s7, 2  ;;  %s43_s8 = sadd.s32 1, %s864_s20 }
  0x30   : > { %p50_p2 = scmp.ne.s32.totalorder %s864_s20, %s860_s19  ;;  %p51_p4 = scmp.eq.s32.totalorder %s876_s23, 0 }
  0x31   : > { %s1217_s7 = smov (%p38_p1, %s36_s7), 0  ;;  %p1198_p8 = scmp.eq.s32.totalorder %s948_s24, 1 }
  0x32   : > { %1197 = sst [smem:[#allocation13_spill]] %s1217_s7  ;;  %p52_p6 = por %p51_p4, %p50_p2 }
  0x33   : > { %p1005_p10 = por %p1198_p8, %p50_p2  ;;  %s40_s10 = ssub.s32 %s872_s22, %s1217_s7 }
  0x34   : > { %p639_p12 = scmp.lt.s32.totalorder %s876_s23, 2  ;;  %p41_p13 = scmp.eq.s32.totalorder %s40_s10, 0 }
  0x35   : > { %s1199_s9 = scalar_select %p1005_p10, 1, 0 }
  0x36   : > { %s1013_s6 = sand.u32 1, %s864_s20   ;;  %s576_s11 = sshll.u32 %s872_s22, 4 }
  0x37   : > { %s1016_s30 = scalar_select %p41_p13, %s864_s20, %s43_s8  }
  0x38   : > { %s223_s12 = scalar_lea.vmem [#allocation2], %s1013_s6  ;;  %s1200_s0 = sld [smem:[#allocation14_spill]] }
  0x39   : > { %s230_s13 = sshll.u32 %s223_s12, 4  ;;  %p1027_p11 = pnand %p639_p12, %p52_p6  ;;  %s1025_s13 = int_to_ptr.vmem [resolvable:$true] %s230_s13 }
  0x3a   : > { %s577_s29 = sshll.u32 %s1013_s6, 3  ;;  %s221_s8 = scalar_lea.sflag [#allocation3], %s1013_s6 }
  0x3b   : > { %p728_p3 = pneg %p1027_p11 }
  0x3e   : > { %s1023_s16 = scalar_lea.hbm %s1200_s0, %s576_s11  ;;  %s731_s14 = scalar_lea.hbm %s1200_s0, 32 }
  0x3f   : > { %s726_s10 = scalar_lea.hbm %s1023_s16, 16  ;;  %p732_p9 = scmp.lt.u32.totalorder %s1023_s16, %s1200_s0 }
  0x40   : > { %p727_p0 = scmp.ne.s32.totalorder %s1023_s16, %s726_s10  ;;  %p733_p1 = scmp.lt.u32.totalorder %s731_s14, %s726_s10 }
  0x41   : > { %p735_p4 = scmp.lt.u32.totalorder %s726_s10, %s1023_s16 }
  0x42   : > { %p729_p5 = pnand %p728_p3, %p727_p0  ;;  %p734_p2 = por %p733_p1, %p732_p9 }
  0x44   : > { %p730_p7 = pneg %p729_p5  ;;  %p736_p6 = por %p735_p4, %p734_p2 }
  0x46   : > { %p737_p8 = pnand %p736_p6, %p730_p7 }
  0x48   : > { %740 = shalt.err (!%p737_p8)
}
  0x49   : > { %s741_s25 = scalar_lea.vmem %s1025_s13, 16  ;;  %s881_s11 = smov [#allocation2]  }
  0x4a   : > { %p742_p12 = scmp.ne.s32.totalorder %s1025_s13, %s741_s25  ;;  %s746_s12 = sshll.u32 %s881_s11, 4  ;;  %s747_s12 = int_to_ptr.vmem [resolvable:$false] %s746_s12 }
  0x4b   : > { %s748_s3 = scalar_lea.vmem %s747_s12, 32  ;;  %p749_p5 = scmp.lt.s32.totalorder %s1025_s13, %s747_s12 }
  0x4c   : > { %p744_p13 = pnand %p742_p12, %p728_p3  ;;  %p750_p9 = scmp.lt.s32.totalorder %s748_s3, %s741_s25 }
  0x4e   : > { %p745_p0 = pneg %p744_p13  ;;  %p751_p1 = por %p750_p9, %p749_p5 }
  0x50   : > { %p752_p2 = pnand %p751_p1, %p745_p0 }
  0x52   : > { %755 = shalt.err (!%p752_p2)
}
  0x53   : > { %630 = dma.hbm_to_vmem [thread:$0]  (!%p1027_p11), %s1023_s16, 16, %s1025_s13, %s221_s8  }
  0x54   : > { %s578_s10 = sshll.u32 %s872_s22, 7  ;;  %s247_s14 = scalar_lea.vmem [#allocation5], %s577_s29 }
  0x55   : > { %s255_s15 = sshll.u32 %s247_s14, 4  ;;  %s1065_s25 = scalar_lea.hbm %s1181_s2, %s578_s10  ;;  %s256_s15 = int_to_ptr.vmem [resolvable:$true] %s255_s15 }
  0x56   : > { %s1202_s12 = sand.u32 1, %s876_s23   ;;  %s756_s7 = scalar_lea.hbm %s1065_s25, 128 }
  0x57   : > { %s244_s3 = scalar_lea.sflag [#allocation6], %s1202_s12  ;;  %p757_p7 = scmp.ne.s32.totalorder %s1065_s25, %s756_s7 }
  0x58   : > { %s761_s16 = scalar_lea.hbm %s1181_s2, 256  ;;  %p762_p8 = scmp.lt.u32.totalorder %s1065_s25, %s1181_s2 }
  0x59   : > { %p759_p4 = pnand %p757_p7, %p728_p3  ;;  %p763_p12 = scmp.lt.u32.totalorder %s761_s16, %s756_s7 }
  0x5a   : > { %p765_p0 = scmp.lt.u32.totalorder %s756_s7, %s1065_s25 }
  0x5b   : > { %p760_p6 = pneg %p759_p4  ;;  %p764_p13 = por %p763_p12, %p762_p8 }
  0x5d   : > { %p766_p5 = por %p765_p0, %p764_p13 }
  0x5f   : > { %p767_p9 = pnand %p766_p5, %p760_p6 }
  0x61   : > { %770 = shalt.err (!%p767_p9)
}
  0x62   : > { %s771_s8 = scalar_lea.vmem %s256_s15, 128  ;;  %s882_s10 = smov [#allocation5]  }
  0x63   : > { %p772_p1 = scmp.ne.s32.totalorder %s256_s15, %s771_s8  ;;  %s776_s14 = sshll.u32 %s882_s10, 4  ;;  %s777_s14 = int_to_ptr.vmem [resolvable:$false] %s776_s14 }
  0x64   : > { %s778_s11 = scalar_lea.vmem %s777_s14, 256  ;;  %p779_p4 = scmp.lt.s32.totalorder %s256_s15, %s777_s14 }
  0x65   : > { %p774_p2 = pnand %p772_p1, %p728_p3  ;;  %p780_p10 = scmp.lt.s32.totalorder %s778_s11, %s771_s8 }
  0x67   : > { %p775_p7 = pneg %p774_p2  ;;  %p781_p8 = por %p780_p10, %p779_p4 }
  0x69   : > { %p782_p12 = pnand %p781_p8, %p775_p7 }
  0x6b   : > { %785 = shalt.err (!%p782_p12)
}
  0x6c   : > { %633 = dma.hbm_to_vmem [thread:$0]  (!%p1027_p11), %s1065_s25, 128, %s256_s15, %s244_s3  }
  0x6d   : > { %p1203_p6 = scmp.ne.s32.totalorder %s1194_s28, 0 }
  0x6e   : > { %s1091_s7 = sand.u32 (!%p1203_p6), 1, %s860_s19   ;;  %p1204_p3 = scmp.ne.s32.totalorder (!%p1203_p6), %s1192_s26, 0 }
  0x6f   : > { %264 = sbr.rel (%p1203_p6) target bundleno = 524 (0x20c), region = 40  ;;  %s267_s12 = scalar_lea.sflag (!%p1203_p6), [#allocation3], %s1091_s7 }
  0x70   : > { %s269_s6 = scalar_lea.vmem (!%p1203_p6), [#allocation2], %s1091_s7 }
  0x76   : > { %839 = dma.done.wait (%p1204_p3), %s267_s12, 16  }
  0x77   : > { %841 = vsyncadd (%p1204_p3), %s267_s12, 4294967280  ;;  %s274_s17 = sand.u32 1, %s948_s24   ;;  %s580_s28 = sshll.u32 %s1091_s7, 3 }
  0x78   : > { %s275_s15 = scalar_lea.sflag [#allocation6], %s274_s17  ;;  %s278_s25 = scalar_lea.vmem [#allocation5], %s580_s28 }
  0x79   : > { %843 = dma.done.wait (%p1204_p3), %s275_s15, 128  }
  0x7a   : > { %845 = vsyncadd (%p1204_p3), %s275_s15, 4294967168  ;;  %p1205_p10 = scmp.eq.s32.totalorder %s948_s24, 0 }
  0x7c   : > { %847 = dma.done.wait (%p1205_p10), [#allocation6], 512   ;;  %p1206_p11 = pmov %p1205_p10 }
  0x7d   : > { %vm320_vm0 = vcmask 261120   ;;  %v319_v0 = vld [vmem:[%s278_s25] sm:$0xff]  ;;  %v353_v4 = vld [vmem:[#allocation7] sm:$0xff]  ;;  %v354_v5 = vld [vmem:[#allocation7 + $0x8] sm:$0xff]  ;;  %v883_v7 = vmov 0.0|0.0   ;;  %vm884_vm1 = vmmov 0  }
  0x7e   : > { %849 = vsyncadd (%p1206_p11), [#allocation6], 4294966784  ;;  %v321_v1 = vsel %vm320_vm0, %v319_v0, 0.0  ;;  %v326_v2 = vmul.f32 %v319_v0, %v319_v0  ;;  %v355_v6 = vld [vmem:[#allocation7 + $0x10] sm:$0xff]  ;;  %607 = vmatprep.subr.bf16.mxu0 %v883_v7  ;;  %v608_v8 = vpack.c.bf16 %v354_v5, %v353_v4  ;;  %v356_v9 = vld [vmem:[#allocation7 + $0x18] sm:$0xff]  ;;  %v885_v10 = vmov 0.0  }
  0x7f   : > { %322 = vadd.xlane.f32.xlu0 %v321_v1  ;;  %604 = vmatprep.mubr.msk.f32.mxu0 %vm884_vm1, %v885_v10  ;;  %v611_v11 = vpack.c.bf16 %v356_v9, %v355_v6  ;;  %p316_p13 = scmp.lt.s32.totalorder %s868_s21, 1  ;;  %v584_v23 = vld [vmem:[%s269_s6] ss:$0 sm:$0xff]  ;;  %s588_s29 = sshll.u32 %s868_s21, 7 }
  0x80   : > { %v327_v3 = vsel %vm320_vm0, %v326_v2, 0.0  ;;  %609 = vmatpush3.bf16.msra.mxu0 %v608_v8  ;;  %v585_v26 = vld [vmem:[%s1183_s4] ss:$0 sm:$0xff]  ;;  %s315_s8 = scalar_lea.vmem [#allocation8], %s580_s28  ;;  %s1130_s12 = scalar_lea.hbm %s1184_s5, %s588_s29 }
  0x81   : > { %610 = vmatprep.subr.bf16.mxu0 %v883_v7  ;;  %s317_s24 = scalar_select %p316_p13, %s868_s21, 1 }
  0x82   : > { %s453_s10 = sshll.u32 %s315_s8, 4  ;;  %s439_s6 = scalar_lea.sflag [#allocation4], %s1091_s7  ;;  %s1132_s10 = int_to_ptr.vmem [resolvable:$true] %s453_s10 }
  0x83   : > { %328 = vadd.xlane.f32.xlu0 %v327_v3  ;;  %s318_s13 = scalar_lea.vmem %s1180_s1, %s317_s24  ;;  %s786_s17 = scalar_lea.vmem %s1132_s10, 128 }
  0x84   : > { %612 = vmatpush3.bf16.msra.mxu0 %v611_v11  ;;  %v583_v19 = vld [vmem:[%s318_s13] ss:$0 sm:$0xff]  ;;  %p787_p0 = scmp.ne.s32.totalorder %s1132_s10, %s786_s17  ;;  %p1207_p5 = scmp.ne.s32.totalorder %s1199_s9, 0 }
  0x85   : > { %s886_s21 = smov [#allocation8]  }
  0x86   : > { %p788_p9 = pnand %p787_p0, %p1207_p5  ;;  %s790_s28 = sshll.u32 %s886_s21, 4  ;;  %s791_s28 = int_to_ptr.vmem [resolvable:$false] %s790_s28 }
  0x87   : > { %s792_s15 = scalar_lea.vmem %s791_s28, 256  ;;  %p793_p2 = scmp.lt.s32.totalorder %s1132_s10, %s791_s28 }
  0x88   : > { %p789_p1 = pneg %p788_p9  ;;  %p794_p7 = scmp.lt.s32.totalorder %s792_s15, %s786_s17 }
  0x8a   : > { %p795_p4 = por %p794_p7, %p793_p2 }
  0x8c   : > { %p796_p8 = pnand %p795_p4, %p789_p1 }
 0x10c   : > { %v323_v12 = vpop.xlane.xlu0 %322 }
 0x10d   : > { %v325_v13 = vmul.f32 0.03125, %v323_v12 }
 0x10f   : > { %v331_v15 = vmul.f32 %v325_v13, %v325_v13  ;;  %v335_v21 = vsub.f32 %v319_v0, %v325_v13 }
 0x110   : > { %v329_v14 = vpop.xlane.xlu0 %328 }
 0x111   : > { %v330_v16 = vmul.f32 0.03125, %v329_v14 }
 0x113   : > { %v332_v17 = vsub.f32 %v330_v16, %v331_v15 }
 0x115   : > { %v333_v18 = vadd.f32 1e-06, %v332_v17 }
 0x117   : > { %696 = vrsqrt.f32 %v333_v18 }
 0x121   : > { %v697_v20 = vpop.eup %696 }
 0x122   : > { %v343_v22 = vmul.f32 %v697_v20, %v583_v19 }
 0x124   : > { %v344_v24 = vmul.f32 %v343_v22, %v335_v21 }
 0x126   : > { %v352_v25 = vadd.f32 %v584_v23, %v344_v24 }
 0x128   : > { %605 = vmatmul.mubr.msk.f32.vlgmr.msra.gmra.mrb[0].mxu0 %vm320_vm0, %v352_v25 }
 0x1fb   : > { %v433_v27 = vpop.f32.mrb[0].mxu0 }
 0x1fc   : > { %v434_v28 = vadd.f32 %v585_v26, %v433_v27  ;;  %v606_v29 = vpop.f32.mrb[1].mxu0 }
 0x1fe   : > { %437 = vst [vmem:[%s315_s8] sm:$0xff] %v434_v28 }
 0x1ff   : > { %799 = shalt.err (!%p796_p8)
}
 0x200   : > { %s800_s7 = scalar_lea.hbm %s1130_s12, 128  ;;  %s804_s26 = scalar_lea.hbm %s1184_s5, 256 }
 0x201   : > { %p801_p12 = scmp.ne.s32.totalorder %s1130_s12, %s800_s7  ;;  %p805_p10 = scmp.lt.u32.totalorder %s1130_s12, %s1184_s5 }
 0x202   : > { %p806_p11 = scmp.lt.u32.totalorder %s804_s26, %s800_s7  ;;  %p808_p0 = scmp.lt.u32.totalorder %s800_s7, %s1130_s12 }
 0x203   : > { %p802_p6 = pnand %p801_p12, %p1207_p5 }
 0x204   : > { %p807_p13 = por %p806_p11, %p805_p10 }
 0x205   : > { %p803_p3 = pneg %p802_p6 }
 0x206   : > { %p809_p9 = por %p808_p0, %p807_p13 }
 0x208   : > { %p810_p1 = pnand %p809_p9, %p803_p3 }
 0x20a   : > { %813 = shalt.err (!%p810_p1)
}
 0x20b   : > { %621 = dma.vmem_to_hbm [thread:$0]  (%p1207_p5), %s1132_s10, 128, %s1130_s12, %s439_s6  }
 0x20c PF: > { %s465_s16 = sand.u32 1, %s856_s18   ;;  %p1208_p2 = scmp.ne.s32.totalorder %s1193_s27, 0 }
 0x20d   : > { %p1209_p7 = scmp.ge.s32.totalorder %s876_s23, 2  ;;  %s466_s0 = scalar_lea.sflag [#allocation4], %s465_s16 }
 0x20f   : > { %p635_p4 = pnand %p1209_p7, %p1208_p2 }
 0x211   : > { %851 = dma.done.wait (!%p635_p4), %s466_s0, 128  }
 0x212   : > { %853 = vsyncadd (!%p635_p4), %s466_s0, 4294967168  ;;  %s24_s23 = sadd.s32 1, %s876_s23   ;;  %s1210_s9 = sld [smem:[#allocation13_spill]] }
 0x213   : > { %p21_p8 = scmp.ge.s32.totalorder %s24_s23, 4   ;;  %s1211_s18 = smov %s860_s19 }
 0x214   : > { %s1212_s19 = smov %s864_s20  ;;  %s1213_s20 = smov %s1016_s30 }
 0x215   : > { %s1214_s21 = smov %s872_s22  ;;  %23 = sbr.rel (!%p21_p8) target bundleno = 11 (0xb), region = 105 }
 0x218   : > { %s1215_s22 = smov %s1210_s9 }
 0x21c   :  { %471 = vsyncpa [#allocation3], 1 }
 0x21d   :  { %473 = vsyncpa [#allocation3 + $0x1], 1 }
 0x21e   :  { %474 = vsyncpa [#allocation6], 1 }
 0x21f   :  { %476 = vsyncpa [#allocation6 + $0x1], 1 }
 0x220   :  { %477 = vsyncpa [#allocation4], 1 }
 0x221   :  { %479 = vsyncpa [#allocation4 + $0x1], 1 }

// kernel: tpu_custom_call.1
= control target key start
LH: loop header
LB: loop body
LE: loop exit
PB: predicated region body
PF: predicated region fallthrough
CT: control target
= control target key end

     0   :  { %s1179_s0 = inlined_call_operand.hbm [shape: f32[2,1,32], index: 0, kind: input, shape index: {}]   ;;  %s1180_s1 = inlined_call_operand.vmem [shape: f32[2,1,32], index: 1, kind: input, shape index: {}]   ;;  %s1181_s2 = inlined_call_operand.hbm [shape: f32[2,8,32], index: 2, kind: input, shape index: {}]   ;;  %s1182_s3 = inlined_call_operand.hbm [shape: f32[32,128], index: 3, kind: input, shape index: {}]   ;;  %s1183_s4 = inlined_call_operand.vmem [shape: f32[1,128], index: 4, kind: input, shape index: {}]   ;;  %s1184_s5 = inlined_call_operand.hbm [shape: f32[2,8,128], index: 5, kind: output, shape index: {}]  }
   0x1   :  { %1190 = sst [smem:[#allocation14_spill]] %s1179_s0 }
   0x2   :  { %1191 = sst [smem:[#allocation15_spill]] %s1182_s3 }
   0x3   :  { %10 = vsyncpa [#allocation3], 0 }
   0x4   :  { %12 = vsyncpa [#allocation3 + $0x1], 0 }
   0x5   :  { %13 = vsyncpa [#allocation6], 0 }
   0x6   :  { %15 = vsyncpa [#allocation6 + $0x1], 0 }
   0x7   :  { %16 = vsyncpa [#allocation4], 0 }
   0x8   :  { %18 = vsyncpa [#allocation4 + $0x1], 0  ;;  %s917_s18 = smov 0   ;;  %s919_s19 = smov 0  }
   0x9   :  { %s921_s20 = smov 0   ;;  %s923_s21 = smov 0  }
   0xa   :  { %s925_s22 = smov 0   ;;  %s927_s23 = smov 0  }
   0xb LB: > { %s948_s24 = sadd.s32 4294967295, %s876_s23   ;;  %s572_s25 = sadd.s32 4294967294, %s876_s23   ;;  %s876_s23 = sphi %s927_s23, %s24_s23   ;;  %s872_s22 = sphi %s925_s22, %s1215_s22   ;;  %s868_s21 = sphi %s923_s21, %s1214_s21   ;;  %s864_s20 = sphi %s921_s20, %s1213_s20   ;;  %s860_s19 = sphi %s919_s19, %s1212_s19   ;;  %s856_s18 = sphi %s917_s18, %s1211_s18  }
   0xc   : > { %p56_p0 = scmp.ne.s32.totalorder %s860_s19, %s856_s18  ;;  %p1185_p1 = scmp.eq.s32.totalorder %s948_s24, 0 }
   0xd   : > { %p184_p3 = scmp.eq.s32.totalorder %s572_s25, 1  ;;  %p573_p5 = scmp.ge.s32.totalorder %s876_s23, 1 }
   0xe   : > { %p957_p4 = por %p1185_p1, %p56_p0  ;;  %p191_p7 = scmp.lt.s32.totalorder %s876_s23, 3 }
   0xf   : > { %p962_p6 = por %p184_p3, %p56_p0  ;;  %s878_s29 = smov [#allocation7]  }
  0x10   : > { %s1192_s26 = scalar_select %p957_p4, 1, 0 }
  0x11   : > { %s1193_s27 = scalar_select %p962_p6, 1, 0 }
  0x12   : > { %p967_p8 = pnand %p573_p5, %p191_p7  ;;  %s203_s30 = sshll.u32 %s878_s29, 4  ;;  %s204_s30 = int_to_ptr.vmem [resolvable:$true] %s203_s30 }
  0x13   : > { %s36_s7 = sadd.s32 1, %s872_s22  ;;  %s1196_s3 = sld [smem:[#allocation15_spill]] }
  0x14   : > { %s1194_s28 = scalar_select %p967_p8, 1, 0 }
  0x15   : > { %p623_p9 = pneg %p967_p8 }
  0x17   : > { %p976_p11 = pnand %p623_p9, %p1185_p1 }
  0x19   : > { %s698_s10 = scalar_lea.hbm %s1196_s3, 512  ;;  %p700_p13 = pneg %p976_p11 }
  0x1a   : > { %p699_p12 = scmp.ne.s32.totalorder %s1196_s3, %s698_s10  ;;  %p705_p5 = scmp.lt.u32.totalorder %s698_s10, %s1196_s3 }
  0x1c   : > { %p701_p0 = pnand %p700_p13, %p699_p12 }
  0x1e   : > { %p702_p3 = pneg %p701_p0 }
  0x20   : > { %p707_p7 = pnand %p705_p5, %p702_p3 }
  0x22   : > { %710 = shalt.err (!%p707_p7)
}
  0x23   : > { %s711_s15 = scalar_lea.vmem %s204_s30, 512  ;;  %p719_p2 = scmp.lt.s32.totalorder %s204_s30, %s204_s30 }
  0x24   : > { %p712_p9 = scmp.ne.s32.totalorder %s204_s30, %s711_s15  ;;  %p720_p6 = scmp.lt.s32.totalorder %s711_s15, %s711_s15 }
  0x26   : > { %p714_p10 = pnand %p712_p9, %p700_p13  ;;  %p721_p4 = por %p720_p6, %p719_p2 }
  0x28   : > { %p715_p1 = pneg %p714_p10 }
  0x2a   : > { %p722_p8 = pnand %p721_p4, %p715_p1 }
  0x2c   : > { %725 = shalt.err (!%p722_p8)
}
  0x2d   : > { %s879_s16 = smov 128   ;;  %s880_s17 = smov 8  }
  0x2e   : > { %626 = dma.hbm_to_vmem [thread:$0]  (!%p976_p11), %s1196_s3, 512, %s204_s30, [#allocation6], %s879_s16, %s879_s16, %s880_s17  }
  0x2f   : > { %p38_p1 = scmp.ge.s32.totalorder %s36_s7, 2  ;;  %s43_s8 = sadd.s32 1, %s864_s20 }
  0x30   : > { %p50_p2 = scmp.ne.s32.totalorder %s864_s20, %s860_s19  ;;  %p51_p4 = scmp.eq.s32.totalorder %s876_s23, 0 }
  0x31   : > { %s1217_s7 = smov (%p38_p1, %s36_s7), 0  ;;  %p1198_p8 = scmp.eq.s32.totalorder %s948_s24, 1 }
  0x32   : > { %1197 = sst [smem:[#allocation13_spill]] %s1217_s7  ;;  %p52_p6 = por %p51_p4, %p50_p2 }
  0x33   : > { %p1005_p10 = por %p1198_p8, %p50_p2  ;;  %s40_s10 = ssub.s32 %s872_s22, %s1217_s7 }
  0x34   : > { %p639_p12 = scmp.lt.s32.totalorder %s876_s23, 2  ;;  %p41_p13 = scmp.eq.s32.totalorder %s40_s10, 0 }
  0x35   : > { %s1199_s9 = scalar_select %p1005_p10, 1, 0 }
  0x36   : > { %s1013_s6 = sand.u32 1, %s864_s20   ;;  %s576_s11 = sshll.u32 %s872_s22, 4 }
  0x37   : > { %s1016_s30 = scalar_select %p41_p13, %s864_s20, %s43_s8  }
  0x38   : > { %s223_s12 = scalar_lea.vmem [#allocation2], %s1013_s6  ;;  %s1200_s0 = sld [smem:[#allocation14_spill]] }
  0x39   : > { %s230_s13 = sshll.u32 %s223_s12, 4  ;;  %p1027_p11 = pnand %p639_p12, %p52_p6  ;;  %s1025_s13 = int_to_ptr.vmem [resolvable:$true] %s230_s13 }
  0x3a   : > { %s577_s29 = sshll.u32 %s1013_s6, 3  ;;  %s221_s8 = scalar_lea.sflag [#allocation3], %s1013_s6 }
  0x3b   : > { %p728_p3 = pneg %p1027_p11 }
  0x3e   : > { %s1023_s16 = scalar_lea.hbm %s1200_s0, %s576_s11  ;;  %s731_s14 = scalar_lea.hbm %s1200_s0, 32 }
  0x3f   : > { %s726_s10 = scalar_lea.hbm %s1023_s16, 16  ;;  %p732_p9 = scmp.lt.u32.totalorder %s1023_s16, %s1200_s0 }
  0x40   : > { %p727_p0 = scmp.ne.s32.totalorder %s1023_s16, %s726_s10  ;;  %p733_p1 = scmp.lt.u32.totalorder %s731_s14, %s726_s10 }
  0x41   : > { %p735_p4 = scmp.lt.u32.totalorder %s726_s10, %s1023_s16 }
  0x42   : > { %p729_p5 = pnand %p728_p3, %p727_p0  ;;  %p734_p2 = por %p733_p1, %p732_p9 }
  0x44   : > { %p730_p7 = pneg %p729_p5  ;;  %p736_p6 = por %p735_p4, %p734_p2 }
  0x46   : > { %p737_p8 = pnand %p736_p6, %p730_p7 }
  0x48   : > { %740 = shalt.err (!%p737_p8)
}
  0x49   : > { %s741_s25 = scalar_lea.vmem %s1025_s13, 16  ;;  %s881_s11 = smov [#allocation2]  }
  0x4a   : > { %p742_p12 = scmp.ne.s32.totalorder %s1025_s13, %s741_s25  ;;  %s746_s12 = sshll.u32 %s881_s11, 4  ;;  %s747_s12 = int_to_ptr.vmem [resolvable:$false] %s746_s12 }
  0x4b   : > { %s748_s3 = scalar_lea.vmem %s747_s12, 32  ;;  %p749_p5 = scmp.lt.s32.totalorder %s1025_s13, %s747_s12 }
  0x4c   : > { %p744_p13 = pnand %p742_p12, %p728_p3  ;;  %p750_p9 = scmp.lt.s32.totalorder %s748_s3, %s741_s25 }
  0x4e   : > { %p745_p0 = pneg %p744_p13  ;;  %p751_p1 = por %p750_p9, %p749_p5 }
  0x50   : > { %p752_p2 = pnand %p751_p1, %p745_p0 }
  0x52   : > { %755 = shalt.err (!%p752_p2)
}
  0x53   : > { %630 = dma.hbm_to_vmem [thread:$0]  (!%p1027_p11), %s1023_s16, 16, %s1025_s13, %s221_s8  }
  0x54   : > { %s578_s10 = sshll.u32 %s872_s22, 7  ;;  %s247_s14 = scalar_lea.vmem [#allocation5], %s577_s29 }
  0x55   : > { %s255_s15 = sshll.u32 %s247_s14, 4  ;;  %s1065_s25 = scalar_lea.hbm %s1181_s2, %s578_s10  ;;  %s256_s15 = int_to_ptr.vmem [resolvable:$true] %s255_s15 }
  0x56   : > { %s1202_s12 = sand.u32 1, %s876_s23   ;;  %s756_s7 = scalar_lea.hbm %s1065_s25, 128 }
  0x57   : > { %s244_s3 = scalar_lea.sflag [#allocation6], %s1202_s12  ;;  %p757_p7 = scmp.ne.s32.totalorder %s1065_s25, %s756_s7 }
  0x58   : > { %s761_s16 = scalar_lea.hbm %s1181_s2, 256  ;;  %p762_p8 = scmp.lt.u32.totalorder %s1065_s25, %s1181_s2 }
  0x59   : > { %p759_p4 = pnand %p757_p7, %p728_p3  ;;  %p763_p12 = scmp.lt.u32.totalorder %s761_s16, %s756_s7 }
  0x5a   : > { %p765_p0 = scmp.lt.u32.totalorder %s756_s7, %s1065_s25 }
  0x5b   : > { %p760_p6 = pneg %p759_p4  ;;  %p764_p13 = por %p763_p12, %p762_p8 }
  0x5d   : > { %p766_p5 = por %p765_p0, %p764_p13 }
  0x5f   : > { %p767_p9 = pnand %p766_p5, %p760_p6 }
  0x61   : > { %770 = shalt.err (!%p767_p9)
}
  0x62   : > { %s771_s8 = scalar_lea.vmem %s256_s15, 128  ;;  %s882_s10 = smov [#allocation5]  }
  0x63   : > { %p772_p1 = scmp.ne.s32.totalorder %s256_s15, %s771_s8  ;;  %s776_s14 = sshll.u32 %s882_s10, 4  ;;  %s777_s14 = int_to_ptr.vmem [resolvable:$false] %s776_s14 }
  0x64   : > { %s778_s11 = scalar_lea.vmem %s777_s14, 256  ;;  %p779_p4 = scmp.lt.s32.totalorder %s256_s15, %s777_s14 }
  0x65   : > { %p774_p2 = pnand %p772_p1, %p728_p3  ;;  %p780_p10 = scmp.lt.s32.totalorder %s778_s11, %s771_s8 }
  0x67   : > { %p775_p7 = pneg %p774_p2  ;;  %p781_p8 = por %p780_p10, %p779_p4 }
  0x69   : > { %p782_p12 = pnand %p781_p8, %p775_p7 }
  0x6b   : > { %785 = shalt.err (!%p782_p12)
}
  0x6c   : > { %633 = dma.hbm_to_vmem [thread:$0]  (!%p1027_p11), %s1065_s25, 128, %s256_s15, %s244_s3  }
  0x6d   : > { %p1203_p6 = scmp.ne.s32.totalorder %s1194_s28, 0 }
  0x6e   : > { %s1091_s7 = sand.u32 (!%p1203_p6), 1, %s860_s19   ;;  %p1204_p3 = scmp.ne.s32.totalorder (!%p1203_p6), %s1192_s26, 0 }
  0x6f   : > { %264 = sbr.rel (%p1203_p6) target bundleno = 524 (0x20c), region = 40  ;;  %s267_s12 = scalar_lea.sflag (!%p1203_p6), [#allocation3], %s1091_s7 }
  0x70   : > { %s269_s6 = scalar_lea.vmem (!%p1203_p6), [#allocation2], %s1091_s7 }
  0x76   : > { %839 = dma.done.wait (%p1204_p3), %s267_s12, 16  }
  0x77   : > { %841 = vsyncadd (%p1204_p3), %s267_s12, 4294967280  ;;  %s274_s17 = sand.u32 1, %s948_s24   ;;  %s580_s28 = sshll.u32 %s1091_s7, 3 }
  0x78   : > { %s275_s15 = scalar_lea.sflag [#allocation6], %s274_s17  ;;  %s278_s25 = scalar_lea.vmem [#allocation5], %s580_s28 }
  0x79   : > { %843 = dma.done.wait (%p1204_p3), %s275_s15, 128  }
  0x7a   : > { %845 = vsyncadd (%p1204_p3), %s275_s15, 4294967168  ;;  %p1205_p10 = scmp.eq.s32.totalorder %s948_s24, 0 }
  0x7c   : > { %847 = dma.done.wait (%p1205_p10), [#allocation6], 512   ;;  %p1206_p11 = pmov %p1205_p10 }
  0x7d   : > { %vm320_vm0 = vcmask 261120   ;;  %v319_v0 = vld [vmem:[%s278_s25] sm:$0xff]  ;;  %v353_v4 = vld [vmem:[#allocation7] sm:$0xff]  ;;  %v354_v5 = vld [vmem:[#allocation7 + $0x8] sm:$0xff]  ;;  %v883_v7 = vmov 0.0|0.0   ;;  %vm884_vm1 = vmmov 0  }
  0x7e   : > { %849 = vsyncadd (%p1206_p11), [#allocation6], 4294966784  ;;  %v321_v1 = vsel %vm320_vm0, %v319_v0, 0.0  ;;  %v326_v2 = vmul.f32 %v319_v0, %v319_v0  ;;  %v355_v6 = vld [vmem:[#allocation7 + $0x10] sm:$0xff]  ;;  %607 = vmatprep.subr.bf16.mxu0 %v883_v7  ;;  %v608_v8 = vpack.c.bf16 %v354_v5, %v353_v4  ;;  %v356_v9 = vld [vmem:[#allocation7 + $0x18] sm:$0xff]  ;;  %v885_v10 = vmov 0.0  }
  0x7f   : > { %322 = vadd.xlane.f32.xlu0 %v321_v1  ;;  %604 = vmatprep.mubr.msk.f32.mxu0 %vm884_vm1, %v885_v10  ;;  %v611_v11 = vpack.c.bf16 %v356_v9, %v355_v6  ;;  %p316_p13 = scmp.lt.s32.totalorder %s868_s21, 1  ;;  %v584_v23 = vld [vmem:[%s269_s6] ss:$0 sm:$0xff]  ;;  %s588_s29 = sshll.u32 %s868_s21, 7 }
  0x80   : > { %v327_v3 = vsel %vm320_vm0, %v326_v2, 0.0  ;;  %609 = vmatpush3.bf16.msra.mxu0 %v608_v8  ;;  %v585_v26 = vld [vmem:[%s1183_s4] ss:$0 sm:$0xff]  ;;  %s315_s8 = scalar_lea.vmem [#allocation8], %s580_s28  ;;  %s1130_s12 = scalar_lea.hbm %s1184_s5, %s588_s29 }
  0x81   : > { %610 = vmatprep.subr.bf16.mxu0 %v883_v7  ;;  %s317_s24 = scalar_select %p316_p13, %s868_s21, 1 }
  0x82   : > { %s453_s10 = sshll.u32 %s315_s8, 4  ;;  %s439_s6 = scalar_lea.sflag [#allocation4], %s1091_s7  ;;  %s1132_s10 = int_to_ptr.vmem [resolvable:$true] %s453_s10 }
  0x83   : > { %328 = vadd.xlane.f32.xlu0 %v327_v3  ;;  %s318_s13 = scalar_lea.vmem %s1180_s1, %s317_s24  ;;  %s786_s17 = scalar_lea.vmem %s1132_s10, 128 }
  0x84   : > { %612 = vmatpush3.bf16.msra.mxu0 %v611_v11  ;;  %v583_v19 = vld [vmem:[%s318_s13] ss:$0 sm:$0xff]  ;;  %p787_p0 = scmp.ne.s32.totalorder %s1132_s10, %s786_s17  ;;  %p1207_p5 = scmp.ne.s32.totalorder %s1199_s9, 0 }
  0x85   : > { %s886_s21 = smov [#allocation8]  }
  0x86   : > { %p788_p9 = pnand %p787_p0, %p1207_p5  ;;  %s790_s28 = sshll.u32 %s886_s21, 4  ;;  %s791_s28 = int_to_ptr.vmem [resolvable:$false] %s790_s28 }
  0x87   : > { %s792_s15 = scalar_lea.vmem %s791_s28, 256  ;;  %p793_p2 = scmp.lt.s32.totalorder %s1132_s10, %s791_s28 }
  0x88   : > { %p789_p1 = pneg %p788_p9  ;;  %p794_p7 = scmp.lt.s32.totalorder %s792_s15, %s786_s17 }
  0x8a   : > { %p795_p4 = por %p794_p7, %p793_p2 }
  0x8c   : > { %p796_p8 = pnand %p795_p4, %p789_p1 }
 0x10c   : > { %v323_v12 = vpop.xlane.xlu0 %322 }
 0x10d   : > { %v325_v13 = vmul.f32 0.03125, %v323_v12 }
 0x10f   : > { %v331_v15 = vmul.f32 %v325_v13, %v325_v13  ;;  %v335_v21 = vsub.f32 %v319_v0, %v325_v13 }
 0x110   : > { %v329_v14 = vpop.xlane.xlu0 %328 }
 0x111   : > { %v330_v16 = vmul.f32 0.03125, %v329_v14 }
 0x113   : > { %v332_v17 = vsub.f32 %v330_v16, %v331_v15 }
 0x115   : > { %v333_v18 = vadd.f32 1e-06, %v332_v17 }
 0x117   : > { %696 = vrsqrt.f32 %v333_v18 }
 0x121   : > { %v697_v20 = vpop.eup %696 }
 0x122   : > { %v343_v22 = vmul.f32 %v697_v20, %v583_v19 }
 0x124   : > { %v344_v24 = vmul.f32 %v343_v22, %v335_v21 }
 0x126   : > { %v352_v25 = vadd.f32 %v584_v23, %v344_v24 }
 0x128   : > { %605 = vmatmul.mubr.msk.f32.vlgmr.msra.gmra.mrb[0].mxu0 %vm320_vm0, %v352_v25 }
 0x1fb   : > { %v433_v27 = vpop.f32.mrb[0].mxu0 }
 0x1fc   : > { %v434_v28 = vadd.f32 %v585_v26, %v433_v27  ;;  %v606_v29 = vpop.f32.mrb[1].mxu0 }
 0x1fe   : > { %437 = vst [vmem:[%s315_s8] sm:$0xff] %v434_v28 }
 0x1ff   : > { %799 = shalt.err (!%p796_p8)
}
 0x200   : > { %s800_s7 = scalar_lea.hbm %s1130_s12, 128  ;;  %s804_s26 = scalar_lea.hbm %s1184_s5, 256 }
 0x201   : > { %p801_p12 = scmp.ne.s32.totalorder %s1130_s12, %s800_s7  ;;  %p805_p10 = scmp.lt.u32.totalorder %s1130_s12, %s1184_s5 }
 0x202   : > { %p806_p11 = scmp.lt.u32.totalorder %s804_s26, %s800_s7  ;;  %p808_p0 = scmp.lt.u32.totalorder %s800_s7, %s1130_s12 }
 0x203   : > { %p802_p6 = pnand %p801_p12, %p1207_p5 }
 0x204   : > { %p807_p13 = por %p806_p11, %p805_p10 }
 0x205   : > { %p803_p3 = pneg %p802_p6 }
 0x206   : > { %p809_p9 = por %p808_p0, %p807_p13 }
 0x208   : > { %p810_p1 = pnand %p809_p9, %p803_p3 }
 0x20a   : > { %813 = shalt.err (!%p810_p1)
}
 0x20b   : > { %621 = dma.vmem_to_hbm [thread:$0]  (%p1207_p5), %s1132_s10, 128, %s1130_s12, %s439_s6  }
 0x20c PF: > { %s465_s16 = sand.u32 1, %s856_s18   ;;  %p1208_p2 = scmp.ne.s32.totalorder %s1193_s27, 0 }
 0x20d   : > { %p1209_p7 = scmp.ge.s32.totalorder %s876_s23, 2  ;;  %s466_s0 = scalar_lea.sflag [#allocation4], %s465_s16 }
 0x20f   : > { %p635_p4 = pnand %p1209_p7, %p1208_p2 }
 0x211   : > { %851 = dma.done.wait (!%p635_p4), %s466_s0, 128  }
 0x212   : > { %853 = vsyncadd (!%p635_p4), %s466_s0, 4294967168  ;;  %s24_s23 = sadd.s32 1, %s876_s23   ;;  %s1210_s9 = sld [smem:[#allocation13_spill]] }
 0x213   : > { %p21_p8 = scmp.ge.s32.totalorder %s24_s23, 4   ;;  %s1211_s18 = smov %s860_s19 }
 0x214   : > { %s1212_s19 = smov %s864_s20  ;;  %s1213_s20 = smov %s1016_s30 }
 0x215   : > { %s1214_s21 = smov %s872_s22  ;;  %23 = sbr.rel (!%p21_p8) target bundleno = 11 (0xb), region = 105 }
 0x218   : > { %s1215_s22 = smov %s1210_s9 }
 0x21c   :  { %471 = vsyncpa [#allocation3], 1 }
 0x21d   :  { %473 = vsyncpa [#allocation3 + $0x1], 1 }
 0x21e   :  { %474 = vsyncpa [#allocation6], 1 }
 0x21f   :  { %476 = vsyncpa [#allocation6 + $0x1], 1 }
 0x220   :  { %477 = vsyncpa [#allocation4], 1 }
 0x221   :  { %479 = vsyncpa [#allocation4 + $0x1], 1 }

</bundles_post_ra>
